<compile_context>
chip_gen: v5e
topology: v5e:2x2
jax: 0.10.0
libtpu: 0.0.40
codegen_flags: <defaults>
</compile_context>

<pallas_src>
import jax
import jax.numpy as jnp
from jax.experimental import pallas as pl
from jax.experimental.pallas import tpu as pltpu

LANE = 128
KP = 8  # feature dim (4) zero-padded to 8 for clean MXU / sublane tiling


def mlp_kernel(xt_ref, w1t_ref, b1_ref, w2t_ref, b2_ref, w3_ref, b3_ref, o_ref):
    # --- Layer 1 on the MXU: (128, 8) bf16 @ (8, tb) bf16 -> f32; bias/ReLU in f32.
    h1 = jnp.dot(w1t_ref[...], xt_ref[...], preferred_element_type=jnp.float32)
    h1 = jnp.maximum(h1 + b1_ref[...], 0.0)                       # (128, tb)

    # TODO(synk): nn.Dropout(0.5) is identity in eval mode; training-mode dropout
    # (pltpu.prng_random_bits mask + 2x rescale) intentionally omitted.

    # --- Layer 2 on the MXU: (64, 128) bf16 @ (128, tb) bf16 -> f32 accumulate.
    h2 = jnp.dot(w2t_ref[...], h1.astype(jnp.bfloat16),
                 preferred_element_type=jnp.float32)
    h2 = jnp.maximum(h2 + b2_ref[...], 0.0)                       # (64, tb)

    # --- Layer 3 (N=1): f32 VPU multiply + XLU sublane reduce; b3 scalar from SMEM.
    o_ref[...] = (jnp.sum(h2 * w3_ref[...], axis=0, keepdims=True)
                  + b3_ref[0])                                    # (1, tb) lane-dense


def _round_up(n, m):
    return ((n + m - 1) // m) * m


def _cdiv(a, b):
    return (a + b - 1) // b


def _tpu_kind():
    try:
        return jax.devices()[0].device_kind.lower()
    except Exception:
        return ""


def _is_v7x(kind):
    return ("v7" in kind) or ("tpu7" in kind) or ("7x" in kind)


def _pick_batch_tile(B, *, cap, multicore):
    """Lane-dense batch tile (multiple of 128, <= cap)."""
    b128 = _round_up(B, LANE)
    if (not multicore) or b128 < 2 * LANE:
        # Single TensorCore (or a single lane tile): one maximal tile, no splitting.
        return min(cap, b128)
    # Two TensorCores (v7x): at least 2 grid steps, prefer an even step count.
    tb = min(cap, _round_up(_cdiv(b128, 2), LANE))
    steps = _cdiv(b128, tb)
    if steps % 2:
        tb = min(cap, _round_up(_cdiv(b128, steps + 1), LANE))
    return tb


def distance_model_forward(x, params, *, tb=None):
    """x: (B, 4) float32. Returns (B, 1) float32. Matches PyTorch eval forward."""
    w1, b1, w2, b2, w3, b3 = params                      # "x @ W" layout (in, out)
    B, Fin = x.shape
    assert Fin == 4
    H1, H2 = w1.shape[1], w2.shape[1]

    kind = _tpu_kind()
    v7x = _is_v7x(kind)
    multicore = v7x                                      # v7x: 2 TC/chip; v5e/v6e: 1
    cap = 8192 if v7x else 16384                         # generation-aware tile cap
    if tb is not None:
        cap = max(LANE, (min(int(tb), cap) // LANE) * LANE)

    tb = _pick_batch_tile(B, cap=cap, multicore=multicore)
    Bp = _round_up(B, tb)                                # padded (ragged-batch safe)
    grid = (Bp // tb,)

    if multicore and grid[0] >= 2:
        dim_sem = (pltpu.CORE_PARALLEL,)                 # real 2-core sharding on v7x
    else:
        dim_sem = (pltpu.ARBITRARY,)                     # serial loop on 1 TC
    vmem_limit = (32 << 20) if v7x else (64 << 20)

    # Single fused transpose + bf16 cast + pad of x (batch onto lanes, features -> 8).
    xt = jnp.pad(x.T.astype(jnp.bfloat16), ((0, KP - Fin), (0, Bp - B)))   # (8, Bp)
    w1t = jnp.pad(w1.T.astype(jnp.bfloat16), ((0, 0), (0, KP - Fin)))      # (128, 8)
    w2t = w2.T.astype(jnp.bfloat16)                                        # (64, 128)
    b1c = b1.reshape(H1, 1).astype(jnp.float32)                            # (128, 1)
    b2c = b2.reshape(H2, 1).astype(jnp.float32)                            # (64, 1)
    w3c = w3.reshape(H2, 1).astype(jnp.float32)                            # (64, 1)
    b3s = b3.reshape(1).astype(jnp.float32)                                # SMEM scalar

    flops = 2 * Bp * (KP * H1 + H1 * H2 + H2)
    bytes_accessed = (2 * KP * Bp + 4 * Bp                       # x^T bf16 in, f32 out
                      + 2 * (KP * H1 + H1 * H2)                  # bf16 weights
                      + 4 * (H1 + H2 + H2 + 1))                  # f32 biases / w3

    full = lambda shape: pl.BlockSpec(shape, lambda i: (0, 0))
    out_t = pl.pallas_call(
        mlp_kernel,
        out_shape=jax.ShapeDtypeStruct((1, Bp), jnp.float32),
        grid_spec=pltpu.PrefetchScalarGridSpec(
            num_scalar_prefetch=0,
            grid=grid,
            in_specs=[
                pl.BlockSpec((KP, tb), lambda i: (0, i)),      # x^T tile (lane-dense)
                full((H1, KP)),                                # W1^T (bf16)
                full((H1, 1)),                                 # b1 column (f32)
                full((H2, H1)),                                # W2^T (bf16)
                full((H2, 1)),                                 # b2 column (f32)
                full((H2, 1)),                                 # w3 column (f32)
                pl.BlockSpec(memory_space=pltpu.SMEM),         # b3 scalar in SMEM
            ],
            out_specs=pl.BlockSpec((1, tb), lambda i: (0, i)),  # lane-dense output
        ),
        compiler_params=pltpu.CompilerParams(
            dimension_semantics=dim_sem,
            vmem_limit_bytes=vmem_limit,
        ),
        cost_estimate=pl.CostEstimate(
            flops=flops, transcendentals=0, bytes_accessed=bytes_accessed),
    )(xt, w1t, b1c, w2t, b2c, w3c, b3s)

    return out_t[:, :B].reshape(B, 1)


def init_params(key):
    """Deterministic synthetic init matching nn.Linear shapes (stored transposed)."""
    ks = jax.random.split(key, 6)

    def linear(kw, kb, fan_in, fan_out):
        bound = 1.0 / jnp.sqrt(fan_in)
        w = jax.random.uniform(kw, (fan_in, fan_out), jnp.float32, -bound, bound)
        b = jax.random.uniform(kb, (1, fan_out), jnp.float32, -bound, bound)
        return w, b

    w1, b1 = linear(ks[0], ks[1], 4, 128)
    w2, b2 = linear(ks[2], ks[3], 128, 64)
    w3, b3 = linear(ks[4], ks[5], 64, 1)
    return (w1, b1, w2, b2, w3, b3)


def _reference(x, params):
    w1, b1, w2, b2, w3, b3 = params
    h = jnp.maximum(x @ w1 + b1, 0.0)
    h = jnp.maximum(h @ w2 + b2, 0.0)
    return h @ w3 + b3


if __name__ == "__main__":
    key = jax.random.PRNGKey(0)
    kx, kx2, kp = jax.random.split(key, 3)
    params = init_params(kp)

    # Small smoke test (single padded tile).  bf16 MXU path -> loosened tolerance
    # (f32 accumulation keeps the error ~1e-2 relative).
    B = 8
    x = jax.random.normal(kx, (B, 4), jnp.float32)
    out = jax.block_until_ready(distance_model_forward(x, params))
    ref = _reference(x, params)
    assert out.shape == (B, 1)
    assert jnp.allclose(out, ref, atol=3e-2, rtol=3e-2), \
        float(jnp.max(jnp.abs(out - ref)))

    # Ragged batch exercising padding (and 2-step CORE_PARALLEL grid on v7x).
    B2 = 300
    x2 = jax.random.normal(kx2, (B2, 4), jnp.float32)
    out2 = jax.block_until_ready(distance_model_forward(x2, params))
    ref2 = _reference(x2, params)
    assert out2.shape == (B2, 1)
    assert jnp.allclose(out2, ref2, atol=3e-2, rtol=3e-2), \
        float(jnp.max(jnp.abs(out2 - ref2)))

    print("KERNEL_OK")
</pallas_src>

<mosaic_0001>
module attributes {stable_mosaic.version = 11 : i64} {
  func.func @mlp_kernel(%arg0: i32, %arg1: memref<8x128xbf16, #tpu.memory_space<vmem>>, %arg2: memref<128x8xbf16, #tpu.memory_space<vmem>>, %arg3: memref<128x1xf32, #tpu.memory_space<vmem>>, %arg4: memref<64x128xbf16, #tpu.memory_space<vmem>>, %arg5: memref<64x1xf32, #tpu.memory_space<vmem>>, %arg6: memref<64x1xf32, #tpu.memory_space<vmem>>, %arg7: memref<1xf32, #tpu.memory_space<smem>>, %arg8: memref<1x128xf32, #tpu.memory_space<vmem>>) attributes {dimension_semantics = [#tpu.dimension_semantics<arbitrary>], iteration_bounds = array<i64: 1>, scalar_prefetch = 0 : i64, scratch_operands = 0 : i64, tpu.core_type = #tpu.core_type<tc>, window_params = [{transform_indices = @transform_0, window_bounds = array<i64: 8, 128>}, {pipeline_mode = #tpu.pipeline_mode<synchronous>, transform_indices = @transform_1, window_bounds = array<i64: 128, 8>}, {pipeline_mode = #tpu.pipeline_mode<synchronous>, transform_indices = @transform_2, window_bounds = array<i64: 128, 1>}, {pipeline_mode = #tpu.pipeline_mode<synchronous>, transform_indices = @transform_3, window_bounds = array<i64: 64, 128>}, {pipeline_mode = #tpu.pipeline_mode<synchronous>, transform_indices = @transform_4, window_bounds = array<i64: 64, 1>}, {pipeline_mode = #tpu.pipeline_mode<synchronous>, transform_indices = @transform_5, window_bounds = array<i64: 64, 1>}, {transform_indices = @transform_6, window_bounds = array<i64: 1>}, {transform_indices = @transform_7, window_bounds = array<i64: 1, 128>}]} {
    %c0 = arith.constant 0 : index
    %c0_0 = arith.constant 0 : index
    %0 = vector.load %arg2[%c0, %c0_0] : memref<128x8xbf16, #tpu.memory_space<vmem>>, vector<128x8xbf16>
    %c0_1 = arith.constant 0 : index
    %c0_2 = arith.constant 0 : index
    %1 = vector.load %arg1[%c0_1, %c0_2] : memref<8x128xbf16, #tpu.memory_space<vmem>>, vector<8x128xbf16>
    %cst = arith.constant dense<0.000000e+00> : vector<128x128xf32>
    %2 = tpu.matmul %0, %1, %cst {dimension_numbers = #tpu.dot_dimension_numbers<[1], [0], [0], [1], [0, 0, 1, 1], [], []>} : vector<128x8xbf16>, vector<8x128xbf16>, vector<128x128xf32> -> vector<128x128xf32>
    %c0_3 = arith.constant 0 : index
    %c0_4 = arith.constant 0 : index
    %3 = vector.load %arg3[%c0_3, %c0_4] : memref<128x1xf32, #tpu.memory_space<vmem>>, vector<128x1xf32>
    %4 = vector.broadcast %3 : vector<128x1xf32> to vector<128x128xf32>
    %5 = arith.addf %2, %4 : vector<128x128xf32>
    %cst_5 = arith.constant 0.000000e+00 : f32
    %6 = vector.broadcast %cst_5 : f32 to vector<128x128xf32>
    %7 = arith.maximumf %5, %6 : vector<128x128xf32>
    %c0_6 = arith.constant 0 : index
    %c0_7 = arith.constant 0 : index
    %8 = vector.load %arg4[%c0_6, %c0_7] : memref<64x128xbf16, #tpu.memory_space<vmem>>, vector<64x128xbf16>
    %9 = arith.truncf %7 : vector<128x128xf32> to vector<128x128xbf16>
    %cst_8 = arith.constant dense<0.000000e+00> : vector<64x128xf32>
    %10 = tpu.matmul %8, %9, %cst_8 {dimension_numbers = #tpu.dot_dimension_numbers<[1], [0], [0], [1], [0, 0, 1, 1], [], []>} : vector<64x128xbf16>, vector<128x128xbf16>, vector<64x128xf32> -> vector<64x128xf32>
    %c0_9 = arith.constant 0 : index
    %c0_10 = arith.constant 0 : index
    %11 = vector.load %arg5[%c0_9, %c0_10] : memref<64x1xf32, #tpu.memory_space<vmem>>, vector<64x1xf32>
    %12 = vector.broadcast %11 : vector<64x1xf32> to vector<64x128xf32>
    %13 = arith.addf %10, %12 : vector<64x128xf32>
    %cst_11 = arith.constant 0.000000e+00 : f32
    %14 = vector.broadcast %cst_11 : f32 to vector<64x128xf32>
    %15 = arith.maximumf %13, %14 : vector<64x128xf32>
    %c0_12 = arith.constant 0 : index
    %c0_13 = arith.constant 0 : index
    %16 = vector.load %arg6[%c0_12, %c0_13] : memref<64x1xf32, #tpu.memory_space<vmem>>, vector<64x1xf32>
    %17 = vector.broadcast %16 : vector<64x1xf32> to vector<64x128xf32>
    %18 = arith.mulf %15, %17 : vector<64x128xf32>
    %cst_14 = arith.constant dense<0.000000e+00> : vector<128xf32>
    %19 = vector.multi_reduction <add>, %18, %cst_14 [0] : vector<64x128xf32> to vector<128xf32>
    %20 = vector.shape_cast %19 : vector<128xf32> to vector<1x128xf32>
    %c0_15 = arith.constant 0 : index
    %21 = memref.load %arg7[%c0_15] : memref<1xf32, #tpu.memory_space<smem>>
    %22 = vector.broadcast %21 : f32 to vector<1x128xf32>
    %23 = arith.addf %20, %22 : vector<1x128xf32>
    %c0_16 = arith.constant 0 : index
    %c0_17 = arith.constant 0 : index
    %24 = vector.load %arg8[%c0_16, %c0_17] : memref<1x128xf32, #tpu.memory_space<vmem>>, vector<1x128xf32>
    tpu.vector_store %arg8[%c0_16, %c0_17], %23 {strides = array<i32>} : memref<1x128xf32, #tpu.memory_space<vmem>>, vector<1x128xf32>,
    return
  }
  func.func @transform_0(%arg0: i32) -> (i32, i32) {
    %c0_i32 = arith.constant 0 : i32
    %c0_i32_0 = arith.constant 0 : i32
    return %c0_i32, %arg0 : i32, i32
  }
  func.func @transform_1(%arg0: i32) -> (i32, i32) {
    %c0_i32 = arith.constant 0 : i32
    %c0_i32_0 = arith.constant 0 : i32
    %c0_i32_1 = arith.constant 0 : i32
    return %c0_i32, %c0_i32_0 : i32, i32
  }
  func.func @transform_2(%arg0: i32) -> (i32, i32) {
    %c0_i32 = arith.constant 0 : i32
    %c0_i32_0 = arith.constant 0 : i32
    %c0_i32_1 = arith.constant 0 : i32
    return %c0_i32, %c0_i32_0 : i32, i32
  }
  func.func @transform_3(%arg0: i32) -> (i32, i32) {
    %c0_i32 = arith.constant 0 : i32
    %c0_i32_0 = arith.constant 0 : i32
    %c0_i32_1 = arith.constant 0 : i32
    return %c0_i32, %c0_i32_0 : i32, i32
  }
  func.func @transform_4(%arg0: i32) -> (i32, i32) {
    %c0_i32 = arith.constant 0 : i32
    %c0_i32_0 = arith.constant 0 : i32
    %c0_i32_1 = arith.constant 0 : i32
    return %c0_i32, %c0_i32_0 : i32, i32
  }
  func.func @transform_5(%arg0: i32) -> (i32, i32) {
    %c0_i32 = arith.constant 0 : i32
    %c0_i32_0 = arith.constant 0 : i32
    %c0_i32_1 = arith.constant 0 : i32
    return %c0_i32, %c0_i32_0 : i32, i32
  }
  func.func @transform_6(%arg0: i32) -> i32 {
    %c0_i32 = arith.constant 0 : i32
    %c0_i32_0 = arith.constant 0 : i32
    return %c0_i32 : i32
  }
  func.func @transform_7(%arg0: i32) -> (i32, i32) {
    %c0_i32 = arith.constant 0 : i32
    %c0_i32_0 = arith.constant 0 : i32
    return %c0_i32, %arg0 : i32, i32
  }
}

</mosaic_0001>

<bundles_post_ra>
// kernel: tpu_custom_call.1
= control target key start
LH: loop header
LB: loop body
LE: loop exit
PB: predicated region body
PF: predicated region fallthrough
CT: control target
= control target key end

     0   :  { %vm207_vm0 = vcmask 1043456   ;;  %v598_v3 = vmov 0   ;;  %vm182_vm1 = vcmask 64512   ;;  %s795_s0 = inlined_call_operand.vmem [shape: bf16[8,128], index: 0, kind: input, shape index: {}]   ;;  %s796_s1 = inlined_call_operand.vmem [shape: bf16[128,8], index: 1, kind: input, shape index: {}]   ;;  %s797_s2 = inlined_call_operand.vmem [shape: f32[128,1], index: 2, kind: input, shape index: {}]   ;;  %s798_s3 = inlined_call_operand.vmem [shape: bf16[64,128], index: 3, kind: input, shape index: {}]   ;;  %s799_s4 = inlined_call_operand.vmem [shape: f32[64,1], index: 4, kind: input, shape index: {}]   ;;  %s800_s5 = inlined_call_operand.vmem [shape: f32[64,1], index: 5, kind: input, shape index: {}]   ;;  %s801_s6 = inlined_call_operand.<no memory space> [shape: f32[1], index: 6, kind: input, shape index: {}]   ;;  %s802_s7 = inlined_call_operand.hbm [shape: f32[1,128], index: 7, kind: output, shape index: {}]  }
   0x1   :  { %v60_v0 = vld [vmem:[%s797_s2 + $0x70] sm:$0xff]  ;;  %v58_v1 = vld [vmem:[%s797_s2 + $0x60] sm:$0xff]  ;;  %570 = vset.pattern.permute.xlu1 %v598_v3  ;;  %569 = vset.pattern.permute.xlu0 %v598_v3  ;;  %v61_v8 = vld [vmem:[%s797_s2 + $0x78] sm:$0xff] }
   0x2   :  { %v45_v2 = vld [vmem:[%s795_s0] sm:$0xf]  ;;  %134 = vperm.xlu0 %569, %v60_v0   ;;  %124 = vperm.xlu1 %570, %v58_v1   ;;  %v56_v7 = vld [vmem:[%s797_s2 + $0x50] sm:$0xff]  ;;  %v59_v9 = vld [vmem:[%s797_s2 + $0x68] sm:$0xff] }
   0x3   :  { %v209_v4 = vsel %vm207_vm0, %v45_v2, 0  ;;  %v546_v5 = vld [vmem:[%s796_s1] sm:$0xff]  ;;  %571 = vset.pattern.permute.xlu2 %v598_v3 }
   0x4   :  { %v550_v6 = vld [vmem:[%s796_s1 + $0x20] sm:$0xff]  ;;  %218 = vmatpush.bf16.msra.mxu0 %v209_v4  ;;  %558 = vmatpush.bf16.msra.mxu2 %v209_v4 }
   0x5   :  { %114 = vperm.xlu2 %571, %v56_v7  }
   0x7   :  { %522 = vmatmul.msk.bf16.vlgmr.msra.gmra.mxu0 %vm182_vm1, %v546_v5  ;;  %526 = vmatmul.msk.bf16.vlgmr.msra.gmra.mxu2 %vm182_vm1, %v550_v6 }
   0x8   :  { %13 = vsyncpa [#allocation4], 0  ;;  %v57_v10 = vld [vmem:[%s797_s2 + $0x58] sm:$0xff]  ;;  %v55_v11 = vld [vmem:[%s797_s2 + $0x48] sm:$0xff]  ;;  %s599_s14 = smov [#allocation3]   ;;  %s481_s17 = sshll.u32 %s802_s7, 4  ;;  %s482_s17 = int_to_ptr.hbm [resolvable:$true] %s481_s17 }
   0x9   :  { %v54_v12 = vld [vmem:[%s797_s2 + $0x40] sm:$0xff]  ;;  %v547_v13 = vld [vmem:[%s796_s1 + $0x8] sm:$0xff]  ;;  %v52_v15 = vld [vmem:[%s797_s2 + $0x30] sm:$0xff] }
   0xa   :  { %139 = vperm.xlu0 %569, %v61_v8   ;;  %129 = vperm.xlu1 %570, %v59_v9   ;;  %v551_v14 = vld [vmem:[%s796_s1 + $0x28] sm:$0xff]  ;;  %v53_v16 = vld [vmem:[%s797_s2 + $0x38] sm:$0xff]  ;;  %v50_v17 = vld [vmem:[%s797_s2 + $0x20] sm:$0xff] }
   0xb   :  { %v51_v18 = vld [vmem:[%s797_s2 + $0x28] sm:$0xff]  ;;  %v49_v19 = vld [vmem:[%s797_s2 + $0x18] sm:$0xff]  ;;  %v48_v20 = vld [vmem:[%s797_s2 + $0x10] sm:$0xff] }
   0xc   :  { %v548_v21 = vld [vmem:[%s796_s1 + $0x10] sm:$0xff]  ;;  %v46_v23 = vld [vmem:[%s797_s2] sm:$0xff]  ;;  %v47_v25 = vld [vmem:[%s797_s2 + $0x8] sm:$0xff] }
   0xd   :  { %119 = vperm.xlu2 %571, %v57_v10   ;;  %v552_v22 = vld [vmem:[%s796_s1 + $0x30] sm:$0xff]  ;;  %v292_v24 = vld [vmem:[%s799_s4] sm:$0xff]  ;;  %v293_v26 = vld [vmem:[%s799_s4 + $0x8] sm:$0xff] }
   0xe   :  { %v295_v27 = vld [vmem:[%s799_s4 + $0x18] sm:$0xff]  ;;  %v294_v28 = vld [vmem:[%s799_s4 + $0x10] sm:$0xff]  ;;  %v296_v31 = vld [vmem:[%s799_s4 + $0x20] sm:$0xff] }
   0xf   :  { %v549_v29 = vld [vmem:[%s796_s1 + $0x18] sm:$0xff]  ;;  %v402_v32 = vld [vmem:[%s800_s5 + $0x8] sm:$0xff]  ;;  %v401_v33 = vld [vmem:[%s800_s5] sm:$0xff] }
  0x10   :  { %v553_v30 = vld [vmem:[%s796_s1 + $0x38] sm:$0xff]  ;;  %v403_v34 = vld [vmem:[%s800_s5 + $0x10] sm:$0xff]  ;;  %v297_v36 = vld [vmem:[%s799_s4 + $0x28] sm:$0xff]  ;;  %s479_s1 = sshll.u32 %s599_s14, 4  ;;  %s480_s1 = int_to_ptr.vmem [resolvable:$true] %s479_s1 }
  0x11   :  { %v404_v35 = vld [vmem:[%s800_s5 + $0x18] sm:$0xff]  ;;  %v298_v37 = vld [vmem:[%s799_s4 + $0x30] sm:$0xff]  ;;  %v405_v39 = vld [vmem:[%s800_s5 + $0x20] sm:$0xff] }
  0x12   :  { %109 = vperm.xlu1 %570, %v55_v11   ;;  %104 = vperm.xlu0 %569, %v54_v12   ;;  %v299_v38 = vld [vmem:[%s799_s4 + $0x38] sm:$0xff]  ;;  %v406_v40 = vld [vmem:[%s800_s5 + $0x28] sm:$0xff]  ;;  %v407_v42 = vld [vmem:[%s800_s5 + $0x30] sm:$0xff] }
  0x13   :  { %v408_v41 = vld [vmem:[%s800_s5 + $0x38] sm:$0xff] }
  0x15   :  { %94 = vperm.xlu2 %571, %v52_v15  }
  0x17   :  { %523 = vmatmul.msk.bf16.gmra.mxu0 %vm182_vm1, %v547_v13  ;;  %527 = vmatmul.msk.bf16.gmra.mxu2 %vm182_vm1, %v551_v14 }
  0x1a   :  { %99 = vperm.xlu0 %569, %v53_v16   ;;  %84 = vperm.xlu1 %570, %v50_v17  }
  0x1d   :  { %89 = vperm.xlu2 %571, %v51_v18  }
  0x22   :  { %79 = vperm.xlu1 %570, %v49_v19   ;;  %74 = vperm.xlu0 %569, %v48_v20  }
  0x25   :  { %64 = vperm.xlu2 %571, %v46_v23  }
  0x27   :  { %524 = vmatmul.msk.bf16.gmra.mxu0 %vm182_vm1, %v548_v21  ;;  %528 = vmatmul.msk.bf16.gmra.mxu2 %vm182_vm1, %v552_v22 }
  0x2a   :  { %302 = vperm.xlu1 %570, %v292_v24   ;;  %69 = vperm.xlu0 %569, %v47_v25  }
  0x2d   :  { %307 = vperm.xlu2 %571, %v293_v26  }
  0x32   :  { %317 = vperm.xlu1 %570, %v295_v27   ;;  %312 = vperm.xlu0 %569, %v294_v28  }
  0x35   :  { %322 = vperm.xlu2 %571, %v296_v31  }
  0x37   :  { %525 = vmatmul.msk.bf16.gmra.mxu0 %vm182_vm1, %v549_v29  ;;  %529 = vmatmul.msk.bf16.gmra.mxu2 %vm182_vm1, %v553_v30 }
  0x3a   :  { %416 = vperm.xlu1 %570, %v402_v32   ;;  %411 = vperm.xlu0 %569, %v401_v33  }
  0x3d   :  { %421 = vperm.xlu2 %571, %v403_v34  }
  0x42   :  { %426 = vperm.xlu1 %570, %v404_v35   ;;  %327 = vperm.xlu0 %569, %v297_v36  }
  0x45   :  { %332 = vperm.xlu2 %571, %v298_v37  }
  0x4a   :  { %337 = vperm.xlu1 %570, %v299_v38   ;;  %431 = vperm.xlu0 %569, %v405_v39  }
  0x4d   :  { %436 = vperm.xlu2 %571, %v406_v40  }
  0x52   :  { %446 = vperm.xlu1 %570, %v408_v41   ;;  %441 = vperm.xlu0 %569, %v407_v42  }
  0x5f   :  { %v115_v57 = vpop.permute.xlu2 %114 }
  0x67   :  { %v120_v62 = vpop.permute.xlu2 %119 }
  0x6f   :  { %v95_v12 = vpop.permute.xlu2 %94 }
  0x74   :  { %v135_v51 = vpop.permute.xlu0 %134  ;;  %v125_v53 = vpop.permute.xlu1 %124 }
  0x77   :  { %v90_v28 = vpop.permute.xlu2 %89 }
  0x7c   :  { %v140_v55 = vpop.permute.xlu0 %139  ;;  %v130_v58 = vpop.permute.xlu1 %129 }
  0x84   :  { %v771_v43 = vpop.f32.mrf.mxu0  ;;  %v105_v60 = vpop.permute.xlu0 %104 }
  0x85   :  { %v110_v63 = vpop.permute.xlu1 %109 }
  0x8a   :  { %v240_v44 = vpop.f32.mrf.mxu2 }
  0x8b   :  { %v241_v18 = vadd.f32 %v240_v44, %v105_v60 }
  0x8c   :  { %v773_v45 = vpop.f32.mrf.mxu0  ;;  %v100_v5 = vpop.permute.xlu0 %99 }
  0x8d   :  { %v85_v19 = vpop.permute.xlu1 %84  ;;  %v268_v27 = vmax.f32 %v241_v18, 0.0 }
  0x92   :  { %v242_v46 = vpop.f32.mrf.mxu2 }
  0x93   :  { %v243_v15 = vadd.f32 %v242_v46, %v110_v63 }
  0x94   :  { %v225_v47 = vpop.f32.mrf.mxu0  ;;  %v75_v23 = vpop.permute.xlu0 %74 }
  0x95   :  { %v269_v22 = vmax.f32 %v243_v15, 0.0  ;;  %v80_v34 = vpop.permute.xlu1 %79  ;;  %v226_v35 = vadd.f32 %v225_v47, %v75_v23 }
  0x97   :  { %v288_v29 = vpack.c.bf16 %v269_v22, %v268_v27  ;;  %v262_v41 = vmax.f32 %v226_v35, 0.0 }
  0x9a   :  { %v245_v48 = vpop.f32.mrf.mxu2 }
  0x9b   :  { %v246_v13 = vadd.f32 %v245_v48, %v115_v57  ;;  %v65_v48 = vpop.permute.xlu2 %64 }
  0x9c   :  { %v227_v50 = vpop.f32.mrf.mxu0  ;;  %v70_v40 = vpop.permute.xlu0 %69 }
  0x9d   :  { %v270_v21 = vmax.f32 %v246_v13, 0.0  ;;  %v228_v36 = vadd.f32 %v227_v50, %v80_v34  ;;  %v223_v44 = vadd.f32 %v773_v45, %v70_v40  ;;  %v555_v45 = vld [vmem:[%s798_s3 + $0x8] sm:$0xff] }
  0x9f   :  { %v263_v42 = vmax.f32 %v228_v36, 0.0 }
  0xa2   :  { %v247_v49 = vpop.f32.mrf.mxu2 }
  0xa3   :  { %v248_v9 = vadd.f32 %v247_v49, %v120_v62  ;;  %v221_v49 = vadd.f32 %v771_v43, %v65_v48  ;;  %v556_v43 = vld [vmem:[%s798_s3 + $0x10] sm:$0xff] }
  0xa4   :  { %v230_v54 = vpop.f32.mrf.mxu0  ;;  %v313_v57 = vpop.permute.xlu0 %312 }
  0xa5   :  { %v271_v16 = vmax.f32 %v248_v9, 0.0  ;;  %v231_v30 = vadd.f32 %v230_v54, %v85_v19  ;;  %v260_v47 = vmax.f32 %v221_v49, 0.0  ;;  %v557_v54 = vld [vmem:[%s798_s3 + $0x18] sm:$0xff] }
  0xa7   :  { %v289_v26 = vpack.c.bf16 %v271_v16, %v270_v21  ;;  %v264_v37 = vmax.f32 %v231_v30, 0.0 }
  0xaa   :  { %v250_v52 = vpop.f32.mrf.mxu2 }
  0xab   :  { %v251_v6 = vadd.f32 %v250_v52, %v125_v53  ;;  %v285_v52 = vpack.c.bf16 %v263_v42, %v262_v41  ;;  %v554_v53 = vld [vmem:[%s798_s3] sm:$0xff] }
  0xac   :  { %v232_v59 = vpop.f32.mrf.mxu0  ;;  %v412_v63 = vpop.permute.xlu0 %411 }
  0xad   :  { %v272_v14 = vmax.f32 %v251_v6, 0.0  ;;  %v233_v31 = vadd.f32 %v232_v59, %v90_v28 }
  0xaf   :  { %v265_v38 = vmax.f32 %v233_v31, 0.0 }
  0xb1   :  { %v286_v46 = vpack.c.bf16 %v265_v38, %v264_v37 }
  0xb2   :  { %v252_v56 = vpop.f32.mrf.mxu2 }
  0xb3   :  { %v253_v3 = vadd.f32 %v252_v56, %v130_v58  ;;  %v308_v56 = vpop.permute.xlu2 %307 }
  0xb4   :  { %v235_v1 = vpop.f32.mrf.mxu0 }
  0xb5   :  { %v273_v10 = vmax.f32 %v253_v3, 0.0  ;;  %v236_v24 = vadd.f32 %v235_v1, %v95_v12 }
  0xb7   :  { %v290_v17 = vpack.c.bf16 %v273_v10, %v272_v14  ;;  %v266_v32 = vmax.f32 %v236_v24, 0.0 }
  0xba   :  { %v255_v61 = vpop.f32.mrf.mxu2 }
  0xbb   :  { %v256_v0 = vadd.f32 %v255_v61, %v135_v51  ;;  %v261_v51 = vmax.f32 %v223_v44, 0.0  ;;  %v323_v60 = vpop.permute.xlu2 %322 }
  0xbc   :  { %v237_v20 = vpop.f32.mrf.mxu0 }
  0xbd   :  { %v274_v7 = vmax.f32 %v256_v0, 0.0  ;;  %v238_v25 = vadd.f32 %v237_v20, %v100_v5  ;;  %v284_v50 = vpack.c.bf16 %v261_v51, %v260_v47 }
  0xbf   :  { %v267_v33 = vmax.f32 %v238_v25, 0.0 }
  0xc1   :  { %v287_v39 = vpack.c.bf16 %v267_v33, %v266_v32 }
  0xc2   :  { %v257_v2 = vpop.f32.mrf.mxu2 }
  0xc3   :  { %v258_v4 = vadd.f32 %v257_v2, %v140_v55  ;;  %v303_v55 = vpop.permute.xlu1 %302  ;;  %v422_v2 = vpop.permute.xlu2 %421 }
  0xc5   :  { %v275_v8 = vmax.f32 %v258_v4, 0.0  ;;  %v328_v4 = vpop.permute.xlu0 %327 }
  0xc7   :  { %v291_v11 = vpack.c.bf16 %v275_v8, %v274_v7 }
  0xc9   :  { %364 = vmatpush.bf16.msra.mxu1 %v291_v11  ;;  %559 = vmatpush.bf16.msra.mxu3 %v291_v11 }
  0xcb   :  { %v318_v59 = vpop.permute.xlu1 %317  ;;  %v333_v13 = vpop.permute.xlu2 %332 }
  0xcd   :  { %365 = vmatpush.bf16.msra.mxu1 %v290_v17  ;;  %560 = vmatpush.bf16.msra.mxu3 %v290_v17  ;;  %v432_v16 = vpop.permute.xlu0 %431 }
  0xd1   :  { %366 = vmatpush.bf16.msra.mxu1 %v289_v26  ;;  %561 = vmatpush.bf16.msra.mxu3 %v289_v26 }
  0xd3   :  { %v417_v0 = vpop.permute.xlu1 %416  ;;  %v437_v32 = vpop.permute.xlu2 %436 }
  0xd5   :  { %367 = vmatpush.bf16.msra.mxu1 %v288_v29  ;;  %562 = vmatpush.bf16.msra.mxu3 %v288_v29  ;;  %v442_v35 = vpop.permute.xlu0 %441 }
  0xd9   :  { %368 = vmatpush.bf16.msra.mxu1 %v287_v39  ;;  %563 = vmatpush.bf16.msra.mxu3 %v287_v39 }
  0xdb   :  { %v427_v7 = vpop.permute.xlu1 %426 }
  0xdd   :  { %369 = vmatpush.bf16.msra.mxu1 %v286_v46  ;;  %564 = vmatpush.bf16.msra.mxu3 %v286_v46 }
  0xe1   :  { %370 = vmatpush.bf16.msra.mxu1 %v285_v52  ;;  %565 = vmatpush.bf16.msra.mxu3 %v285_v52 }
  0xe3   :  { %v338_v25 = vpop.permute.xlu1 %337 }
  0xe5   :  { %371 = vmatpush.bf16.msra.mxu1 %v284_v50  ;;  %566 = vmatpush.bf16.msra.mxu3 %v284_v50 }
  0xe8   :  { %372 = vmatmul.bf16.vlgmr.msra.gmra.mxu1 %v554_v53  ;;  %377 = vmatmul.bf16.vlgmr.msra.gmra.mxu3 %v555_v45  ;;  %v471_v53 = vstv %s801_s6 }
  0xeb   :  { %v447_v42 = vpop.permute.xlu1 %446 }
  0xf8   :  { %382 = vmatmul.bf16.gmra.mxu3 %v556_v43 }
 0x108   :  { %387 = vmatmul.bf16.gmra.mxu3 %v557_v54 }
 0x165   :  { %v373_v61 = vpop.f32.mrf.mxu1 }
 0x166   :  { %v374_v6 = vadd.f32 %v373_v61, %v303_v55 }
 0x168   :  { %v393_v10 = vmax.f32 %v374_v6, 0.0 }
 0x16a   :  { %v449_v17 = vmul.f32 %v412_v63, %v393_v10 }
 0x16b   :  { %v378_v58 = vpop.f32.mrf.mxu3 }
 0x16c   :  { %v379_v11 = vadd.f32 %v378_v58, %v313_v57 }
 0x16d   :  { %v375_v3 = vpop.f32.mrf.mxu1 }
 0x16e   :  { %v376_v5 = vadd.f32 %v375_v3, %v308_v56  ;;  %v395_v18 = vmax.f32 %v379_v11, 0.0 }
 0x170   :  { %v394_v9 = vmax.f32 %v376_v5, 0.0  ;;  %v451_v26 = vmul.f32 %v422_v2, %v395_v18 }
 0x172   :  { %v450_v14 = vmul.f32 %v417_v0, %v394_v9 }
 0x173   :  { %v380_v62 = vpop.f32.mrf.mxu3 }
 0x174   :  { %v381_v12 = vadd.f32 %v380_v62, %v318_v59  ;;  %v457_v22 = vadd.f32 %v450_v14, %v449_v17 }
 0x176   :  { %v396_v19 = vmax.f32 %v381_v12, 0.0  ;;  %v458_v29 = vadd.f32 %v457_v22, %v451_v26 }
 0x178   :  { %v452_v27 = vmul.f32 %v427_v7, %v396_v19 }
 0x17a   :  { %v459_v33 = vadd.f32 %v458_v29, %v452_v27 }
 0x17b   :  { %v383_v1 = vpop.f32.mrf.mxu3 }
 0x17c   :  { %v384_v15 = vadd.f32 %v383_v1, %v323_v60 }
 0x17e   :  { %v397_v23 = vmax.f32 %v384_v15, 0.0 }
 0x180   :  { %v453_v30 = vmul.f32 %v432_v16, %v397_v23 }
 0x182   :  { %v460_v37 = vadd.f32 %v459_v33, %v453_v30 }
 0x183   :  { %v385_v8 = vpop.f32.mrf.mxu3 }
 0x184   :  { %v386_v20 = vadd.f32 %v385_v8, %v328_v4 }
 0x186   :  { %v398_v28 = vmax.f32 %v386_v20, 0.0 }
 0x188   :  { %v454_v34 = vmul.f32 %v437_v32, %v398_v28 }
 0x18a   :  { %v461_v40 = vadd.f32 %v460_v37, %v454_v34 }
 0x18b   :  { %v388_v21 = vpop.f32.mrf.mxu3 }
 0x18c   :  { %v389_v24 = vadd.f32 %v388_v21, %v333_v13 }
 0x18e   :  { %v399_v31 = vmax.f32 %v389_v24, 0.0 }
 0x190   :  { %v455_v38 = vmul.f32 %v442_v35, %v399_v31 }
 0x192   :  { %v462_v44 = vadd.f32 %v461_v40, %v455_v38 }
 0x193   :  { %v390_v36 = vpop.f32.mrf.mxu3 }
 0x194   :  { %v391_v39 = vadd.f32 %v390_v36, %v338_v25 }
 0x196   :  { %v400_v41 = vmax.f32 %v391_v39, 0.0 }
 0x198   :  { %v456_v46 = vmul.f32 %v447_v42, %v400_v41 }
 0x19a   :  { %v463_v48 = vadd.f32 %v462_v44, %v456_v46 }
 0x19c   :  { %v464_v49 = vrot.slane %v463_v48, 4 }
 0x19e   :  { %v465_v51 = vadd.f32 %v464_v49, %v463_v48 }
 0x1a0   :  { %v466_v52 = vrot.slane %v465_v51, 2 }
 0x1a2   :  { %v467_v47 = vadd.f32 %v466_v52, %v465_v51 }
 0x1a4   :  { %v468_v50 = vrot.slane %v467_v47, 1 }
 0x1a6   :  { %v469_v45 = vadd.f32 %v468_v50, %v467_v47 }
 0x1a8   :  { %v472_v43 = vadd.f32 %v471_v53, %v469_v45 }
 0x1aa   :  { %473 = vst [vmem:[#allocation3] sm:$0x1] %v472_v43 }
 0x1ab   :  { %484 = dma.vmem_to_hbm [thread:$0]  %s480_s1, 16, %s482_s17, [#allocation4]  }
 0x1ac   :  { %596 = dma.done.wait [#allocation4], 16  }
 0x1ad   :  { %597 = vsyncadd [#allocation4], 4294967280 }
 0x1ae   :  { %489 = vsyncpa [#allocation4], 1 }

</bundles_post_ra>
